<compile_context>
chip_gen: v6e
topology: v6e:2x2x1
jax: 0.10.0
libtpu: 0.0.40
codegen_flags: <defaults>
</compile_context>

<pallas_src>
import functools
import numpy as np
import jax
import jax.numpy as jnp
from jax.experimental import pallas as pl
from jax.experimental.pallas import tpu as pltpu


def _round_up(x, m):
    return ((x + m - 1) // m) * m


def _cdiv(a, b):
    return -(-a // b)


# ----------------------------------------------------------------------------
# Pallas kernel 1: batched "actor 0" copy for forward()  (pure block copies).
# Inputs are already sliced to actor 0, so the kernel only moves 1*F per scene.
# ----------------------------------------------------------------------------
def _copy_blocks_kernel(*refs):
    n = len(refs) // 2
    for i in range(n):
        refs[n + i][...] = refs[i][...]


def _copy_call(arrs):
    """One pallas_call copying each [S, F_k] slab through VMEM (single grid step)."""
    in_specs = [pl.BlockSpec(a.shape, lambda i, nd=a.ndim: (0,) * nd) for a in arrs]
    out_specs = tuple(pl.BlockSpec(a.shape, lambda i, nd=a.ndim: (0,) * nd) for a in arrs)
    out_shape = tuple(jax.ShapeDtypeStruct(a.shape, a.dtype) for a in arrs)
    return pl.pallas_call(
        _copy_blocks_kernel,
        out_shape=out_shape,
        grid=(1,),
        in_specs=in_specs,
        out_specs=out_specs,
    )(*arrs)


def _prep_row0(x):
    """Slice actor 0 BEFORE stacking/transfer. Returns ([1, F] device row, rest, dtype)."""
    rest = tuple(x.shape[1:])
    F = int(np.prod(rest)) if rest else 1
    if isinstance(x, np.ndarray):
        x = x[0:1]                       # host slice: only the needed row goes H2D
    x = jnp.asarray(x)
    orig_dtype = x.dtype
    row = x[0:1].reshape(1, F)           # device slice: only 1*F elements copied
    if orig_dtype == jnp.bool_:
        row = row.astype(jnp.int8)       # keep the copy narrow
    return row, rest, orig_dtype


def _restore_one(row, rest, orig_dtype):
    v = np.asarray(row).reshape((1,) + tuple(rest))
    if orig_dtype == jnp.bool_:
        v = v.astype(np.bool_)
    return v


def _restore_rows(mat, rest, orig_dtype):
    return [_restore_one(mat[i:i + 1], rest, orig_dtype) for i in range(mat.shape[0])]


def _slice_actor0_lists(regs, gts, hass):
    """Pallas-backed equivalent of [x[0:1] for x in lst] for the three lists."""
    S = len(regs)
    if S == 0:
        return [], [], []

    groups = []
    for lst in (regs, gts, hass):
        rows, rests, dtypes = [], [], []
        for x in lst:
            row, rest, dt = _prep_row0(x)
            rows.append(row)
            rests.append(rest)
            dtypes.append(dt)
        groups.append((rows, rests, dtypes))

    uniform = all(
        all(r.shape == rows[0].shape and r.dtype == rows[0].dtype for r in rows)
        for rows, _, _ in groups)

    if uniform:
        reg_rows, reg_rests, reg_dts = groups[0]
        gt_rows, gt_rests, gt_dts = groups[1]
        has_rows, has_rests, has_dts = groups[2]

        reg_mat = jnp.concatenate(reg_rows, axis=0)      # [S, F_reg]
        gt_mat = jnp.concatenate(gt_rows, axis=0)        # [S, F_gt]
        has_mat = jnp.concatenate(has_rows, axis=0)      # [S, F_has] int8
        F_reg = reg_mat.shape[1]

        if reg_mat.dtype == gt_mat.dtype:
            # Lane-dense float slab (reg || gt on the lane axis): 2 ins / 2 outs.
            float_slab = jnp.concatenate([reg_mat, gt_mat], axis=1)
            outs = jax.device_get(_copy_call([float_slab, has_mat]))  # one D2H
            reg_out = outs[0][:, :F_reg]
            gt_out = outs[0][:, F_reg:]
            has_out = outs[1]
        else:
            outs = jax.device_get(_copy_call([reg_mat, gt_mat, has_mat]))
            reg_out, gt_out, has_out = outs

        return (_restore_rows(reg_out, reg_rests[0], reg_dts[0]),
                _restore_rows(gt_out, gt_rests[0], gt_dts[0]),
                _restore_rows(has_out, has_rests[0], has_dts[0]))

    # Ragged trailing shapes across scenes: one fused copy per scene, launched
    # without any host sync, then a SINGLE batched device_get at the end.
    pending = []
    for i in range(S):
        pending.append(_copy_call([groups[k][0][i] for k in range(3)]))
    host = jax.device_get(pending)
    results = ([], [], [])
    for i in range(S):
        for k in range(3):
            rest = groups[k][1][i]
            dt = groups[k][2][i]
            results[k].append(_restore_one(host[i][k], rest, dt))
    return results


# ----------------------------------------------------------------------------
# Pallas kernel 2: pred_metrics (distance error + ADE/FDE/argmin reductions).
# One grid step per chunk of scenes; scenes sit on the lane dimension.
# ----------------------------------------------------------------------------
def _pred_metrics_kernel(p_ref, g_ref, idx_ref, sums_ref, *, n_total):
    # p_ref:   [M, 2, T, Nb]   (modes, xy, time, scenes-on-lanes)
    # g_ref:   [2, T, Nb]
    # idx_ref: [1, Nb] int32   (per-scene best mode, lane-dense)
    # sums_ref:[1, 4] f32 SMEM (ade1_sum, fde1_sum, ade_sum, fde_sum for this chunk)
    M, _, T, Nb = p_ref.shape
    c = pl.program_id(0)

    p = p_ref[...]
    g = g_ref[...]

    dx = p[:, 0] - g[0]
    dy = p[:, 1] - g[1]
    err = jnp.sqrt(dx * dx + dy * dy)                         # [M, T, Nb]

    # Scene-validity mask (lanes beyond n_total are chunk padding). where-select
    # keeps the sums NaN/Inf-safe regardless of padded-lane contents.
    lane = jax.lax.broadcasted_iota(jnp.int32, (1, Nb), 1)
    valid = (c * Nb + lane) < n_total                         # [1, Nb] bool

    err0 = err[0]                                             # [T, Nb], mode 0
    last = err[:, T - 1, :]                                   # [M, Nb]
    ade1_sum = jnp.sum(jnp.where(valid, err0, 0.0))
    fde1_sum = jnp.sum(jnp.where(valid, last[0:1], 0.0))

    # Best mode by final-step error (first index on ties, like np.argmin).
    min_val = jnp.min(last, axis=0, keepdims=True)            # [1, Nb]
    miota = jax.lax.broadcasted_iota(jnp.int32, (M, Nb), 0)
    min_idx = jnp.min(jnp.where(last == min_val, miota, M),
                      axis=0, keepdims=True)                  # [1, Nb]
    idx_ref[...] = min_idx.astype(jnp.int32)

    onehot = miota == min_idx                                 # [M, Nb]
    err_min = jnp.sum(jnp.where(onehot[:, None, :], err, 0.0), axis=0)  # [T, Nb]
    ade_sum = jnp.sum(jnp.where(valid, err_min, 0.0))
    fde_sum = jnp.sum(jnp.where(valid, min_val, 0.0))         # selected-mode final err

    sums_ref[0, 0] = ade1_sum
    sums_ref[0, 1] = fde1_sum
    sums_ref[0, 2] = ade_sum
    sums_ref[0, 3] = fde_sum


_MAX_SCENE_CHUNK = 2048   # configurable; ~3.5 MB/block for M=6, T=30 -> fits all gens


def _num_tensorcores():
    try:
        kind = jax.devices()[0].device_kind.lower()
    except Exception:
        return 1
    return 2 if "v7" in kind else 1    # v7x has 2 TensorCores per chip


def _choose_chunks(n):
    n_cores = _num_tensorcores()
    # On v7x aim for >= 2 chunks so the "parallel" grid axis feeds both cores;
    # on v5e/v6e (1 TC) keep a single big chunk to avoid per-step overhead.
    target = _cdiv(n, n_cores) if n_cores > 1 else n
    nb = min(_MAX_SCENE_CHUNK, _round_up(max(target, 1), 128))
    return nb, _cdiv(n, nb)


def _vmem_limit_bytes(M, T, Nb):
    # Double-buffered input blocks + slack. Only override the scoped-VMEM default
    # when blocks get large (v5e default is 16 MiB; v7x physical VMEM is 64 MiB).
    need = 2 * (M * 2 * T * Nb * 4 + 2 * T * Nb * 4) + (1 << 20)
    if need <= (14 << 20):
        return None
    return min(need + (4 << 20), 48 << 20)


@functools.lru_cache(maxsize=None)
def _build_metrics_fn(N, M, T, Nb, num_chunks):
    """Cached jit: cast + pad + transpose + pallas_call fused into one compiled fn."""
    N_pad = Nb * num_chunks
    call = pl.pallas_call(
        functools.partial(_pred_metrics_kernel, n_total=N),
        out_shape=(
            jax.ShapeDtypeStruct((1, N_pad), jnp.int32),          # per-scene argmin
            jax.ShapeDtypeStruct((num_chunks, 4), jnp.float32),   # per-chunk partial sums
        ),
        grid=(num_chunks,),
        in_specs=[
            pl.BlockSpec((M, 2, T, Nb), lambda c: (0, 0, 0, c)),
            pl.BlockSpec((2, T, Nb), lambda c: (0, 0, c)),
        ],
        out_specs=(
            pl.BlockSpec((1, Nb), lambda c: (0, c)),
            pl.BlockSpec((1, 4), lambda c: (c, 0),
                         memory_space=pltpu.MemorySpace.SMEM),
        ),
        compiler_params=pltpu.CompilerParams(
            dimension_semantics=("parallel",),
            vmem_limit_bytes=_vmem_limit_bytes(M, T, Nb)),
    )

    def run(preds, gt_preds):
        p = preds.astype(jnp.float32)
        g = gt_preds.astype(jnp.float32)
        if N_pad != N:
            # Pad fuses with the transpose below inside this jit (one copy pass).
            p = jnp.pad(p, ((0, N_pad - N), (0, 0), (0, 0), (0, 0)))
            g = jnp.pad(g, ((0, N_pad - N), (0, 0), (0, 0)))
        p_t = jnp.transpose(p, (1, 3, 2, 0))   # [M, 2, T, N_pad]  (scenes on lanes)
        g_t = jnp.transpose(g, (2, 1, 0))      # [2, T, N_pad]
        return call(p_t, g_t)

    return jax.jit(run)


def pred_metrics_pallas(preds, gt_preds, has_preds):
    """Pallas version of pred_metrics. preds [N, M, T, 2], gt_preds [N, T, 2]."""
    if isinstance(has_preds, np.ndarray):
        assert has_preds.all()                 # host check, no device sync
    else:
        assert bool(jnp.all(has_preds))        # device input: one small reduction

    # No numpy round trip: device arrays stay on device, host arrays go H2D once.
    preds = jnp.asarray(preds)
    gt_preds = jnp.asarray(gt_preds)
    N, M, T, _ = preds.shape

    Nb, num_chunks = _choose_chunks(N)
    fn = _build_metrics_fn(N, M, T, Nb, num_chunks)
    idx_out, sums = jax.device_get(fn(preds, gt_preds))   # single D2H for both outputs

    totals = sums.sum(axis=0)
    ade1 = float(totals[0]) / (N * T)
    fde1 = float(totals[1]) / N
    ade = float(totals[2]) / (N * T)
    fde = float(totals[3]) / N
    min_idcs = idx_out[0, :N].astype(np.int64)
    return ade1, fde1, ade, fde, min_idcs


# ----------------------------------------------------------------------------
# PostProcess module (JAX / Pallas version).
# ----------------------------------------------------------------------------
class PostProcess:
    def __init__(self, config):
        self.config = config

    def forward(self, out, data):
        # TODO(synk): dict/list bookkeeping stays in Python; the per-scene x[0:1]
        # slice + host transfer are batched into one Pallas call / one device_get.
        preds, gts, has = _slice_actor0_lists(out['reg'], data['gt_preds'],
                                              data['has_preds'])
        post_out = dict()
        post_out['preds'] = preds
        post_out['gt_preds'] = gts
        post_out['has_preds'] = has
        return post_out


# Pure numpy reference (verbatim semantics of the torch-side pred_metrics).
def pred_metrics_ref(preds, gt_preds, has_preds):
    assert has_preds.all()
    preds = np.asarray(preds, np.float32)
    gt_preds = np.asarray(gt_preds, np.float32)
    err = np.sqrt(((preds - np.expand_dims(gt_preds, 1)) ** 2).sum(3))
    ade1 = err[:, 0].mean()
    fde1 = err[:, 0, -1].mean()
    min_idcs = err[:, :, -1].argmin(1)
    row_idcs = np.arange(len(min_idcs)).astype(np.int64)
    err = err[row_idcs, min_idcs]
    ade = err.mean()
    fde = err[:, -1].mean()
    return ade1, fde1, ade, fde, min_idcs


if __name__ == "__main__":
    key = jax.random.PRNGKey(0)
    n_scenes, A, M, T = 3, 4, 6, 8   # scenes, actors/scene, modes, prediction steps

    k_reg, k_gt, k_big = jax.random.split(key, 3)
    reg_list = [jax.random.normal(jax.random.fold_in(k_reg, i), (A, M, T, 2), jnp.float32)
                for i in range(n_scenes)]
    gt_list = [jax.random.normal(jax.random.fold_in(k_gt, i), (A, T, 2), jnp.float32)
               for i in range(n_scenes)]
    has_list = [jnp.ones((A, T), dtype=jnp.bool_) for _ in range(n_scenes)]

    out = {'reg': reg_list}
    data = {'gt_preds': gt_list, 'has_preds': has_list}

    post = PostProcess(config=dict())
    post_out = post.forward(out, data)

    # Check the forward() slicing against plain indexing.
    for i in range(n_scenes):
        np.testing.assert_allclose(post_out['preds'][i], np.asarray(reg_list[i][0:1]),
                                   rtol=0, atol=0)
        np.testing.assert_allclose(post_out['gt_preds'][i], np.asarray(gt_list[i][0:1]),
                                   rtol=0, atol=0)
        assert post_out['has_preds'][i].dtype == np.bool_
        assert np.array_equal(post_out['has_preds'][i], np.asarray(has_list[i][0:1]))

    # display()-style metric computation on the accumulated (host) predictions.
    preds = np.concatenate(post_out['preds'], 0)          # [N, M, T, 2]
    gt_preds = np.concatenate(post_out['gt_preds'], 0)    # [N, T, 2]
    has_preds = np.concatenate(post_out['has_preds'], 0)  # [N, T]

    res = pred_metrics_pallas(preds, gt_preds, has_preds)
    ref = pred_metrics_ref(preds, gt_preds, has_preds)
    for a, b in zip(res[:4], ref[:4]):
        np.testing.assert_allclose(a, b, rtol=1e-4, atol=1e-4)
    assert np.array_equal(res[4], ref[4])

    # Larger run with DEVICE inputs: exercises the no-roundtrip path, the lane
    # masking of the ragged last chunk, and (on v7x) the multi-chunk grid.
    N_big = 700
    big_p = jax.random.normal(jax.random.fold_in(k_big, 0), (N_big, M, T, 2), jnp.float32)
    big_g = jax.random.normal(jax.random.fold_in(k_big, 1), (N_big, T, 2), jnp.float32)
    big_h = np.ones((N_big, T), dtype=np.bool_)
    big_p, big_g = jax.block_until_ready((big_p, big_g))
    res = pred_metrics_pallas(big_p, big_g, big_h)
    ref = pred_metrics_ref(np.asarray(big_p), np.asarray(big_g), big_h)
    for a, b in zip(res[:4], ref[:4]):
        np.testing.assert_allclose(a, b, rtol=1e-4, atol=1e-4)
    assert np.array_equal(res[4], ref[4])

    print("KERNEL_OK")
</pallas_src>

<mosaic_0001>
module attributes {stable_mosaic.version = 11 : i64} {
  func.func @_copy_blocks_kernel(%arg0: i32, %arg1: memref<3x112xf32, #tpu.memory_space<vmem>>, %arg2: memref<3x8xi8, #tpu.memory_space<vmem>>, %arg3: memref<3x112xf32, #tpu.memory_space<vmem>>, %arg4: memref<3x8xi8, #tpu.memory_space<vmem>>) attributes {dimension_semantics = [#tpu.dimension_semantics<arbitrary>], iteration_bounds = array<i64: 1>, scalar_prefetch = 0 : i64, scratch_operands = 0 : i64, tpu.core_type = #tpu.core_type<tc>, window_params = [{pipeline_mode = #tpu.pipeline_mode<synchronous>, transform_indices = @transform_0, window_bounds = array<i64: 3, 112>}, {pipeline_mode = #tpu.pipeline_mode<synchronous>, transform_indices = @transform_1, window_bounds = array<i64: 3, 8>}, {pipeline_mode = #tpu.pipeline_mode<synchronous>, transform_indices = @transform_2, window_bounds = array<i64: 3, 112>}, {pipeline_mode = #tpu.pipeline_mode<synchronous>, transform_indices = @transform_3, window_bounds = array<i64: 3, 8>}]} {
    %c0 = arith.constant 0 : index
    %c0_0 = arith.constant 0 : index
    %0 = vector.load %arg1[%c0, %c0_0] : memref<3x112xf32, #tpu.memory_space<vmem>>, vector<3x112xf32>
    %c0_1 = arith.constant 0 : index
    %c0_2 = arith.constant 0 : index
    %1 = vector.load %arg3[%c0_1, %c0_2] : memref<3x112xf32, #tpu.memory_space<vmem>>, vector<3x112xf32>
    tpu.vector_store %arg3[%c0_1, %c0_2], %0 {strides = array<i32>} : memref<3x112xf32, #tpu.memory_space<vmem>>, vector<3x112xf32>,
    %c0_3 = arith.constant 0 : index
    %c0_4 = arith.constant 0 : index
    %2 = vector.load %arg2[%c0_3, %c0_4] : memref<3x8xi8, #tpu.memory_space<vmem>>, vector<3x8xi8>
    %c0_5 = arith.constant 0 : index
    %c0_6 = arith.constant 0 : index
    %3 = vector.load %arg4[%c0_5, %c0_6] : memref<3x8xi8, #tpu.memory_space<vmem>>, vector<3x8xi8>
    tpu.vector_store %arg4[%c0_5, %c0_6], %2 {strides = array<i32>} : memref<3x8xi8, #tpu.memory_space<vmem>>, vector<3x8xi8>,
    return
  }
  func.func @transform_0(%arg0: i32) -> (i32, i32) {
    %c0_i32 = arith.constant 0 : i32
    %c0_i32_0 = arith.constant 0 : i32
    %c0_i32_1 = arith.constant 0 : i32
    return %c0_i32, %c0_i32_0 : i32, i32
  }
  func.func @transform_1(%arg0: i32) -> (i32, i32) {
    %c0_i32 = arith.constant 0 : i32
    %c0_i32_0 = arith.constant 0 : i32
    %c0_i32_1 = arith.constant 0 : i32
    return %c0_i32, %c0_i32_0 : i32, i32
  }
  func.func @transform_2(%arg0: i32) -> (i32, i32) {
    %c0_i32 = arith.constant 0 : i32
    %c0_i32_0 = arith.constant 0 : i32
    %c0_i32_1 = arith.constant 0 : i32
    return %c0_i32, %c0_i32_0 : i32, i32
  }
  func.func @transform_3(%arg0: i32) -> (i32, i32) {
    %c0_i32 = arith.constant 0 : i32
    %c0_i32_0 = arith.constant 0 : i32
    %c0_i32_1 = arith.constant 0 : i32
    return %c0_i32, %c0_i32_0 : i32, i32
  }
}

</mosaic_0001>

<bundles_post_ra>
// kernel: tpu_custom_call.1
= control target key start
LH: loop header
LB: loop body
LE: loop exit
PB: predicated region body
PF: predicated region fallthrough
CT: control target
= control target key end

     0   :  { %9 = vsyncpa [#allocation3], 0  ;;  %s170_s0 = inlined_call_operand.hbm [shape: f32[3,112], index: 0, kind: input, shape index: {}]   ;;  %s171_s1 = inlined_call_operand.vmem [shape: s8[3,8], index: 1, kind: input, shape index: {}]   ;;  %s172_s2 = inlined_call_operand.hbm [shape: f32[3,112], index: 2, kind: output, shape index: {0}]   ;;  %s173_s3 = inlined_call_operand.hbm [shape: s8[3,8], index: 3, kind: output, shape index: {1}]  }
   0x1   :  { %10 = vsyncpa [#allocation4], 0 }
   0x2   :  { %11 = vsyncpa [#allocation7], 0  ;;  %s135_s12 = smov [#allocation2]  }
   0x3   :  { %s18_s13 = sshll.u32 %s135_s12, 4  ;;  %s19_s13 = int_to_ptr.vmem [resolvable:$true] %s18_s13 }
   0x4   :  { %s77_s14 = scalar_lea.vmem %s19_s13, 64  ;;  %p82_p1 = scmp.lt.s32.totalorder %s19_s13, %s19_s13 }
   0x5   :  { %p78_p0 = scmp.ne.s32.totalorder %s19_s13, %s77_s14  ;;  %p83_p2 = scmp.lt.s32.totalorder %s77_s14, %s77_s14 }
   0x7   :  { %p84_p3 = por %p83_p2, %p82_p1 }
   0x9   :  { %p85_p4 = pnand %p84_p3, %p78_p0 }
   0xb   :  { %88 = shalt.err (!%p85_p4)
}
   0xc   :  { %21 = dma.hbm_to_vmem [thread:$0]  %s170_s0, 64, %s19_s13, [#allocation3]  }
   0xd   :  { %129 = dma.done.wait [#allocation3], 64  }
   0xe   :  { %130 = vsyncadd [#allocation3], 4294967232  ;;  %vm31_vm0 = vcmask 57344   ;;  %vm32_vm1 = vsmask.f32 512  ;;  %s136_s17 = smov [#allocation5]  }
   0xf   :  { %s43_s18 = sshll.u32 %s136_s17, 4  ;;  %s137_s19 = smov [#allocation6]   ;;  %vm28_vm2 = vcmask 911360   ;;  %vm33_vm3 = vmand %vm31_vm0, %vm32_vm1  ;;  %v27_v0 = vld [vmem:[#allocation2] sm:$0x7]  ;;  %s44_s18 = int_to_ptr.vmem [resolvable:$true] %s43_s18 }
  0x10   :  { %s53_s20 = sshll.u32 %s137_s19, 4  ;;  %v30_v1 = vld [vmem:[%s171_s1] sm:$0x1]  ;;  %v34_v2 = vld [vmem:[#allocation6] sm:$0x1]  ;;  %s89_s0 = scalar_lea.vmem %s44_s18, 64  ;;  %s54_s20 = int_to_ptr.vmem [resolvable:$true] %s53_s20 }
  0x11   :  { %29 = vst.msk [vmem:[#allocation5] sm:$0x7] %vm28_vm2, %v27_v0  ;;  %v35_v3 = vsel %vm33_vm3, %v30_v1, %v34_v2  ;;  %p90_p5 = scmp.ne.s32.totalorder %s44_s18, %s89_s0  ;;  %p94_p6 = scmp.lt.s32.totalorder %s44_s18, %s44_s18 }
  0x12   :  { %36 = vst [vmem:[#allocation6] sm:$0x1] %v35_v3  ;;  %p95_p7 = scmp.lt.s32.totalorder %s89_s0, %s89_s0 }
  0x14   :  { %p96_p8 = por %p95_p7, %p94_p6 }
  0x16   :  { %p97_p9 = pnand %p96_p8, %p90_p5 }
  0x18   :  { %100 = shalt.err (!%p97_p9)
}
  0x19   :  { %46 = dma.vmem_to_hbm [thread:$0]  %s44_s18, 64, %s172_s2, [#allocation4]  }
  0x1a   :  { %s109_s25 = scalar_lea.vmem %s54_s20, 16  ;;  %s113_s26 = scalar_lea.vmem %s54_s20, 32 }
  0x1b   :  { %p110_p10 = scmp.ne.s32.totalorder %s54_s20, %s109_s25  ;;  %p114_p11 = scmp.lt.s32.totalorder %s54_s20, %s54_s20 }
  0x1c   :  { %p115_p12 = scmp.lt.s32.totalorder %s113_s26, %s109_s25 }
  0x1e   :  { %p116_p13 = por %p115_p12, %p114_p11 }
  0x20   :  { %p117_p0 = pnand %p116_p13, %p110_p10 }
  0x22   :  { %120 = shalt.err (!%p117_p0)
}
  0x23   :  { %56 = dma.vmem_to_hbm [thread:$0]  %s54_s20, 16, %s173_s3, [#allocation7]  }
  0x24   :  { %131 = dma.done.wait [#allocation4], 64  }
  0x25   :  { %132 = vsyncadd [#allocation4], 4294967232 }
  0x26   :  { %133 = dma.done.wait [#allocation7], 16  }
  0x27   :  { %134 = vsyncadd [#allocation7], 4294967280 }
  0x28   :  { %63 = vsyncpa [#allocation3], 1 }
  0x29   :  { %64 = vsyncpa [#allocation4], 1 }
  0x2a   :  { %65 = vsyncpa [#allocation7], 1 }

</bundles_post_ra>
